<compile_context>
chip_gen: v7x
topology: tpu7x:2x2x1
jax: 0.10.0
libtpu: 0.0.40
codegen_flags: <defaults>
</compile_context>

<pallas_src>
import functools

import numpy as np

import jax
import jax.numpy as jnp
from jax.experimental import pallas as pl
from jax.experimental.pallas import tpu as pltpu


def cnn_kernel(x_ref, w_ref, b_ref, mask_ref, w_fc_ref, b_fc_ref, out_ref, *,
               seq_len, max_k, block_cols):
    """One batch tile (Bt elements) per grid step.

    x_ref    : [1, Bt*S, E]       f32 input tile (cast to bf16 in-kernel)
    w_ref    : [E, max_k*CB]      fused (fc_input + conv) weights, tap-major,
                                  each tap block CB lanes (128-multiple), bf16
    b_ref    : [1, CB]            fused per-output-column bias (f32)
    mask_ref : [1, S, CB]         1.0 where time t is a valid conv output for
                                  that column's branch, else 0.0 (f32)
    w_fc_ref : [CB, OUT]          final fc weight, zero rows on padded lanes, bf16
    b_fc_ref : [1, OUT]           final fc bias (f32)
    out_ref  : [1, Bt, OUT]       output block (f32)
    """
    S = seq_len
    CB = block_cols
    Bt = out_ref.shape[1]
    R = Bt * S

    # In-kernel cast (VPU) -- x is DMA'd as f32, no wrapper-side astype pass.
    x = x_ref[0].astype(w_ref.dtype)                              # [R, E]

    # Single fused MXU pass: fc_input folded into every (branch, tap) column.
    big = jnp.dot(x, w_ref[...], preferred_element_type=jnp.float32)  # [R, max_k*CB]

    # K-tap shifted adds. Tap blocks are lane-aligned (CB % 128 == 0) so each
    # slice is a whole-vreg block; the time shift is a sublane roll (XLU).
    # Rows whose shift wraps into the next batch element are invalid conv
    # positions and are zeroed by the mask before the max.
    acc = big[:, 0:CB]
    for k in range(1, max_k):
        acc = acc + pltpu.roll(big[:, k * CB:(k + 1) * CB], shift=R - k, axis=0)

    conved = jnp.maximum(acc + b_ref[...], 0.0)                   # [R, CB], f32
    # Free relayout when S % 8 == 0 (sublane-aligned split of the row axis).
    conved = conved.reshape(Bt, S, CB) * mask_ref[...]            # mask invalid t
    pooled = jnp.max(conved, axis=1)                              # [Bt, CB]

    # Final fc (dropout = eval-mode identity). Padded rows of w_fc are zero.
    out = jnp.dot(pooled.astype(w_fc_ref.dtype), w_fc_ref[...],
                  preferred_element_type=jnp.float32) + b_fc_ref[...]
    out_ref[0] = out.astype(out_ref.dtype)


def cnn_forward(x, params, *, filter_sizes, n_filters, batch_tile=None,
                compute_dtype=jnp.bfloat16):
    """x: [B, S, E] float32. params: output of prepare_params()."""
    B, S, E = x.shape
    F = n_filters
    nb = len(filter_sizes)
    max_k = max(filter_sizes)
    OUT = params["b_fc"].shape[-1]
    CB = params["w_fused"].shape[-1] // max_k
    assert S >= max_k, "sequence shorter than largest filter"

    if batch_tile is None:
        # Aim for >=512 matmul rows per grid step (fills 256x256 MXU passes and
        # amortizes the ~0.35us per-step overhead on v5e/v6e), capped by B.
        # TODO(synk): chunk the conv/pool phase over time for very large tiles.
        batch_tile = max(1, min(B, 512 // max(S, 1)))
    Bt = batch_tile
    G = pl.cdiv(B, Bt)
    Bp = G * Bt
    if Bp != B:                                   # pad batch to a tile multiple
        x = jnp.pad(x, ((0, Bp - B), (0, 0), (0, 0)))

    # Free metadata reshape (no dtype cast here -- cast happens in-kernel).
    xf = x.reshape(G, Bt * S, E)

    w_fused = params["w_fused"].astype(compute_dtype)   # [E, max_k*CB]
    b_conv = params["b_conv"].astype(jnp.float32)       # [1, CB]
    w_fc = params["w_fc"].astype(compute_dtype)         # [CB, OUT]
    b_fc = params["b_fc"].astype(jnp.float32)           # [1, OUT]

    # Valid-time mask: column i*F+f (branch i) is valid at t <= S - K_i;
    # padded lanes always masked (they pool to 0 and hit zero fc rows).
    mask = np.zeros((1, S, CB), np.float32)
    for i, K in enumerate(filter_sizes):
        mask[0, :S - K + 1, i * F:(i + 1) * F] = 1.0
    mask = jnp.asarray(mask)

    kernel = functools.partial(cnn_kernel, seq_len=S, max_k=max_k,
                               block_cols=CB)

    def whole(a):
        r = a.ndim
        return pl.BlockSpec(a.shape, lambda g, _r=r: (0,) * _r)
        # TODO(synk): at PhoBERT scale, single-buffer these grid-invariant
        # inputs (pl.Buffered(1) / pl.ANY + one-time DMA) to save VMEM on v7x.

    out = pl.pallas_call(
        kernel,
        out_shape=jax.ShapeDtypeStruct((G, Bt, OUT), jnp.float32),
        grid=(G,),
        in_specs=[
            pl.BlockSpec((1, Bt * S, E), lambda g: (g, 0, 0)),   # x tile (f32)
            whole(w_fused), whole(b_conv), whole(mask),
            whole(w_fc), whole(b_fc),
        ],
        out_specs=pl.BlockSpec((1, Bt, OUT), lambda g: (g, 0, 0)),
        compiler_params=pltpu.CompilerParams(
            dimension_semantics=("parallel",)),
        # TODO(synk): set vmem_limit_bytes explicitly when re-budgeting the
        # batch tile for v7x's 64 MiB VMEM at real PhoBERT shapes.
    )(xf, w_fused, b_conv, mask, w_fc, b_fc)

    return out.reshape(Bp, OUT)[:B]


# ---------------------------------------------------------------------------
# Host-side parameter handling (torch-layout params -> fused kernel layout)
# ---------------------------------------------------------------------------

def init_params(key, embedding_dim, n_filters, filter_sizes, output_dim):
    """Parameters in the PyTorch layout of the original module."""
    E, F, OUT = embedding_dim, n_filters, output_dim
    ks = jax.random.split(key, 12)
    p = {}
    p["fc_input_w"] = jax.random.normal(ks[0], (E, E), jnp.float32) * 0.05   # [out,in]
    p["fc_input_b"] = jax.random.normal(ks[1], (E,), jnp.float32) * 0.05
    for i, K in enumerate(filter_sizes):
        p[f"conv{i}_w"] = jax.random.normal(ks[2 + 2 * i], (F, E, K),
                                            jnp.float32) * 0.05              # Conv1d [F,E,K]
        p[f"conv{i}_b"] = jax.random.normal(ks[3 + 2 * i], (F,),
                                            jnp.float32) * 0.05
    p["fc_w"] = jax.random.normal(ks[10], (OUT, len(filter_sizes) * F),
                                  jnp.float32) * 0.05
    p["fc_b"] = jax.random.normal(ks[11], (OUT,), jnp.float32) * 0.05
    return p


def prepare_params(p, filter_sizes, n_filters, *, lane=128):
    """Fold fc_input into the conv weights; lay columns out tap-major with each
    tap block zero-padded to a multiple of 128 lanes (lane-aligned slices)."""
    F = n_filters
    nb = len(filter_sizes)
    max_k = max(filter_sizes)
    E = p["fc_input_w"].shape[0]
    CB = ((nb * F + lane - 1) // lane) * lane        # padded tap-block width

    w_in = np.asarray(p["fc_input_w"], np.float32)   # [E, E]  (out, in)
    b_in = np.asarray(p["fc_input_b"], np.float32)   # [E]

    # W_big[:, k*CB + i*F + f] = conv_i weight tap k, filter f   ([E] column).
    w_big = np.zeros((E, max_k * CB), np.float32)
    for i, K in enumerate(filter_sizes):
        w = np.asarray(p[f"conv{i}_w"], np.float32)  # [F, E, K]
        for k in range(K):
            w_big[:, k * CB + i * F: k * CB + (i + 1) * F] = w[:, :, k].T

    # Fold fc_input (eval mode): emb = x @ w_in.T + b_in
    #   => emb @ W_big = x @ (w_in.T @ W_big) + b_in @ W_big.
    w_fused = w_in.T @ w_big                          # f32 product; cast later
    b_big = b_in @ w_big                              # [max_k * CB]

    # Per-output-column bias: conv bias + folded fc_input bias summed over taps
    # (padded-tap columns of W_big are zero, so their b_big terms are zero).
    b_big_taps = b_big.reshape(max_k, CB).sum(axis=0)
    b_conv = np.zeros((1, CB), np.float32)
    for i, K in enumerate(filter_sizes):
        b_conv[0, i * F:(i + 1) * F] = (np.asarray(p[f"conv{i}_b"], np.float32)
                                        + b_big_taps[i * F:(i + 1) * F])

    # Final fc on the padded pooled vector (padded rows zero -> no effect).
    OUT = p["fc_b"].shape[0]
    w_fc = np.zeros((CB, OUT), np.float32)
    w_fc[:nb * F, :] = np.asarray(p["fc_w"], np.float32).T
    b_fc = np.asarray(p["fc_b"], np.float32)[None, :]

    return dict(w_fused=jnp.asarray(w_fused), b_conv=jnp.asarray(b_conv),
                w_fc=jnp.asarray(w_fc), b_fc=jnp.asarray(b_fc))


def ref_forward(x, p, filter_sizes):
    """Pure-JAX f32 reference mirroring the PyTorch forward (eval mode)."""
    emb = x @ p["fc_input_w"].T + p["fc_input_b"]              # [B, S, E]
    emb_ncw = jnp.transpose(emb, (0, 2, 1))                    # [B, E, S]
    pooled = []
    for i, _K in enumerate(filter_sizes):
        w = p[f"conv{i}_w"]                                    # [F, E, K]
        conv = jax.lax.conv_general_dilated(
            emb_ncw, w, window_strides=(1,), padding="VALID",
            dimension_numbers=("NCH", "OIH", "NCH"))           # [B, F, L]
        conv = jax.nn.relu(conv + p[f"conv{i}_b"][None, :, None])
        pooled.append(jnp.max(conv, axis=2))                   # [B, F]
    cat = jnp.concatenate(pooled, axis=1)                      # [B, 4F]
    return cat @ p["fc_w"].T + p["fc_b"]


if __name__ == "__main__":
    # Small shapes consistent with the module's forward.
    B, S = 8, 8                      # batch, sequence length
    embedding_dim = 32
    n_filters = 16
    filter_sizes = (1, 2, 3, 4)
    output_dim = 4

    key = jax.random.PRNGKey(0)
    kx, kp = jax.random.split(key)
    x = jax.random.normal(kx, (B, S, embedding_dim), jnp.float32)
    torch_params = init_params(kp, embedding_dim, n_filters, filter_sizes,
                               output_dim)
    kparams = prepare_params(torch_params, filter_sizes, n_filters)

    out = cnn_forward(x, kparams, filter_sizes=filter_sizes,
                      n_filters=n_filters, batch_tile=4,   # grid=(2,) -> both v7x TCs
                      compute_dtype=jnp.bfloat16)
    out = jax.block_until_ready(out)

    ref = ref_forward(x, torch_params, filter_sizes)
    assert out.shape == (B, output_dim)
    # bf16 matmul operands with f32 accumulation -> loose-ish tolerance.
    assert jnp.allclose(out, ref, atol=3e-2, rtol=3e-2), (
        jnp.max(jnp.abs(out - ref)), out, ref)

    print("KERNEL_OK")
</pallas_src>

<mosaic_0001>
module attributes {stable_mosaic.version = 11 : i64} {
  func.func @cnn_kernel(%arg0: i32, %arg1: memref<1x32x32xf32, #tpu.memory_space<vmem>>, %arg2: memref<32x512xbf16, #tpu.memory_space<vmem>>, %arg3: memref<1x128xf32, #tpu.memory_space<vmem>>, %arg4: memref<1x8x128xf32, #tpu.memory_space<vmem>>, %arg5: memref<128x4xbf16, #tpu.memory_space<vmem>>, %arg6: memref<1x4xf32, #tpu.memory_space<vmem>>, %arg7: memref<1x4x4xf32, #tpu.memory_space<vmem>>) attributes {dimension_semantics = [#tpu.dimension_semantics<parallel>], iteration_bounds = array<i64: 2>, scalar_prefetch = 0 : i64, scratch_operands = 0 : i64, tpu.core_type = #tpu.core_type<tc>, window_params = [{transform_indices = @transform_0, window_bounds = array<i64: 1, 32, 32>}, {pipeline_mode = #tpu.pipeline_mode<synchronous>, transform_indices = @transform_1, window_bounds = array<i64: 32, 512>}, {pipeline_mode = #tpu.pipeline_mode<synchronous>, transform_indices = @transform_2, window_bounds = array<i64: 1, 128>}, {pipeline_mode = #tpu.pipeline_mode<synchronous>, transform_indices = @transform_3, window_bounds = array<i64: 1, 8, 128>}, {pipeline_mode = #tpu.pipeline_mode<synchronous>, transform_indices = @transform_4, window_bounds = array<i64: 128, 4>}, {pipeline_mode = #tpu.pipeline_mode<synchronous>, transform_indices = @transform_5, window_bounds = array<i64: 1, 4>}, {transform_indices = @transform_6, window_bounds = array<i64: 1, 4, 4>}]} {
    %c0 = arith.constant 0 : index
    %c0_0 = arith.constant 0 : index
    %c0_1 = arith.constant 0 : index
    %0 = vector.load %arg1[%c0, %c0_0, %c0_1] : memref<1x32x32xf32, #tpu.memory_space<vmem>>, vector<1x32x32xf32>
    %1 = vector.shape_cast %0 : vector<1x32x32xf32> to vector<32x32xf32>
    %2 = arith.truncf %1 : vector<32x32xf32> to vector<32x32xbf16>
    %c0_2 = arith.constant 0 : index
    %c0_3 = arith.constant 0 : index
    %3 = vector.load %arg2[%c0_2, %c0_3] : memref<32x512xbf16, #tpu.memory_space<vmem>>, vector<32x512xbf16>
    %cst = arith.constant dense<0.000000e+00> : vector<32x512xf32>
    %4 = tpu.matmul %2, %3, %cst {dimension_numbers = #tpu.dot_dimension_numbers<[1], [0], [0], [1], [0, 0, 1, 1], [], []>} : vector<32x32xbf16>, vector<32x512xbf16>, vector<32x512xf32> -> vector<32x512xf32>
    %5 = vector.extract_strided_slice %4 {offsets = [0, 0], sizes = [32, 128], strides = [1, 1]} : vector<32x512xf32> to vector<32x128xf32>
    %6 = vector.extract_strided_slice %4 {offsets = [0, 128], sizes = [32, 128], strides = [1, 1]} : vector<32x512xf32> to vector<32x128xf32>
    %c31_i32 = arith.constant 31 : i32
    %7 = tpu.dynamic_rotate %6 by %c31_i32 dim 0 : vector<32x128xf32>, i32 -> vector<32x128xf32>
    %8 = arith.addf %5, %7 : vector<32x128xf32>
    %9 = vector.extract_strided_slice %4 {offsets = [0, 256], sizes = [32, 128], strides = [1, 1]} : vector<32x512xf32> to vector<32x128xf32>
    %c30_i32 = arith.constant 30 : i32
    %10 = tpu.dynamic_rotate %9 by %c30_i32 dim 0 : vector<32x128xf32>, i32 -> vector<32x128xf32>
    %11 = arith.addf %8, %10 : vector<32x128xf32>
    %12 = vector.extract_strided_slice %4 {offsets = [0, 384], sizes = [32, 128], strides = [1, 1]} : vector<32x512xf32> to vector<32x128xf32>
    %c29_i32 = arith.constant 29 : i32
    %13 = tpu.dynamic_rotate %12 by %c29_i32 dim 0 : vector<32x128xf32>, i32 -> vector<32x128xf32>
    %14 = arith.addf %11, %13 : vector<32x128xf32>
    %c0_4 = arith.constant 0 : index
    %c0_5 = arith.constant 0 : index
    %15 = vector.load %arg3[%c0_4, %c0_5] : memref<1x128xf32, #tpu.memory_space<vmem>>, vector<1x128xf32>
    %16 = vector.broadcast %15 : vector<1x128xf32> to vector<32x128xf32>
    %17 = arith.addf %14, %16 : vector<32x128xf32>
    %cst_6 = arith.constant 0.000000e+00 : f32
    %18 = vector.broadcast %cst_6 : f32 to vector<32x128xf32>
    %19 = arith.maximumf %17, %18 : vector<32x128xf32>
    %20 = vector.shape_cast %19 : vector<32x128xf32> to vector<4x8x128xf32>
    %c0_7 = arith.constant 0 : index
    %c0_8 = arith.constant 0 : index
    %c0_9 = arith.constant 0 : index
    %21 = vector.load %arg4[%c0_7, %c0_8, %c0_9] : memref<1x8x128xf32, #tpu.memory_space<vmem>>, vector<1x8x128xf32>
    %22 = vector.broadcast %21 : vector<1x8x128xf32> to vector<4x8x128xf32>
    %23 = arith.mulf %20, %22 : vector<4x8x128xf32>
    %cst_10 = arith.constant dense<0xFF800000> : vector<4x128xf32>
    %24 = vector.multi_reduction <maximumf>, %23, %cst_10 [1] : vector<4x8x128xf32> to vector<4x128xf32>
    %25 = arith.truncf %24 : vector<4x128xf32> to vector<4x128xbf16>
    %c0_11 = arith.constant 0 : index
    %c0_12 = arith.constant 0 : index
    %26 = vector.load %arg5[%c0_11, %c0_12] : memref<128x4xbf16, #tpu.memory_space<vmem>>, vector<128x4xbf16>
    %cst_13 = arith.constant dense<0.000000e+00> : vector<4x4xf32>
    %27 = tpu.matmul %25, %26, %cst_13 {dimension_numbers = #tpu.dot_dimension_numbers<[1], [0], [0], [1], [0, 0, 1, 1], [], []>} : vector<4x128xbf16>, vector<128x4xbf16>, vector<4x4xf32> -> vector<4x4xf32>
    %c0_14 = arith.constant 0 : index
    %c0_15 = arith.constant 0 : index
    %28 = vector.load %arg6[%c0_14, %c0_15] : memref<1x4xf32, #tpu.memory_space<vmem>>, vector<1x4xf32>
    %29 = vector.broadcast %28 : vector<1x4xf32> to vector<4x4xf32>
    %30 = arith.addf %27, %29 : vector<4x4xf32>
    %c0_16 = arith.constant 0 : index
    %c0_17 = arith.constant 0 : index
    %c0_18 = arith.constant 0 : index
    %31 = vector.load %arg7[%c0_16, %c0_17, %c0_18] : memref<1x4x4xf32, #tpu.memory_space<vmem>>, vector<1x4x4xf32>
    %32 = vector.shape_cast %31 : vector<1x4x4xf32> to vector<4x4xf32>
    %33 = vector.shape_cast %30 : vector<4x4xf32> to vector<1x4x4xf32>
    tpu.vector_store %arg7[%c0_16, %c0_17, %c0_18], %33 {strides = array<i32>} : memref<1x4x4xf32, #tpu.memory_space<vmem>>, vector<1x4x4xf32>,
    return
  }
  func.func @transform_0(%arg0: i32) -> (i32, i32, i32) {
    %c0_i32 = arith.constant 0 : i32
    %c0_i32_0 = arith.constant 0 : i32
    %c0_i32_1 = arith.constant 0 : i32
    return %arg0, %c0_i32, %c0_i32_0 : i32, i32, i32
  }
  func.func @transform_1(%arg0: i32) -> (i32, i32) {
    %c0_i32 = arith.constant 0 : i32
    %c0_i32_0 = arith.constant 0 : i32
    %c0_i32_1 = arith.constant 0 : i32
    return %c0_i32, %c0_i32_0 : i32, i32
  }
  func.func @transform_2(%arg0: i32) -> (i32, i32) {
    %c0_i32 = arith.constant 0 : i32
    %c0_i32_0 = arith.constant 0 : i32
    %c0_i32_1 = arith.constant 0 : i32
    return %c0_i32, %c0_i32_0 : i32, i32
  }
  func.func @transform_3(%arg0: i32) -> (i32, i32, i32) {
    %c0_i32 = arith.constant 0 : i32
    %c0_i32_0 = arith.constant 0 : i32
    %c0_i32_1 = arith.constant 0 : i32
    %c0_i32_2 = arith.constant 0 : i32
    return %c0_i32, %c0_i32_0, %c0_i32_1 : i32, i32, i32
  }
  func.func @transform_4(%arg0: i32) -> (i32, i32) {
    %c0_i32 = arith.constant 0 : i32
    %c0_i32_0 = arith.constant 0 : i32
    %c0_i32_1 = arith.constant 0 : i32
    return %c0_i32, %c0_i32_0 : i32, i32
  }
  func.func @transform_5(%arg0: i32) -> (i32, i32) {
    %c0_i32 = arith.constant 0 : i32
    %c0_i32_0 = arith.constant 0 : i32
    %c0_i32_1 = arith.constant 0 : i32
    return %c0_i32, %c0_i32_0 : i32, i32
  }
  func.func @transform_6(%arg0: i32) -> (i32, i32, i32) {
    %c0_i32 = arith.constant 0 : i32
    %c0_i32_0 = arith.constant 0 : i32
    %c0_i32_1 = arith.constant 0 : i32
    return %arg0, %c0_i32, %c0_i32_0 : i32, i32, i32
  }
}

</mosaic_0001>

<bundles_post_ra>
// kernel: tpu_custom_call.1
= control target key start
LH: loop header
LB: loop body
LE: loop exit
PB: predicated region body
PF: predicated region fallthrough
CT: control target
= control target key end

     0   :  { %11 = vsyncpa [#allocation3], 0  ;;  %s1194_s0 = inlined_call_operand.vmem [shape: f32[2,32,32], index: 0, kind: input, shape index: {}]   ;;  %s1195_s1 = inlined_call_operand.hbm [shape: bf16[32,512], index: 1, kind: input, shape index: {}]   ;;  %s1196_s2 = inlined_call_operand.vmem [shape: f32[1,128], index: 2, kind: input, shape index: {}]   ;;  %s1197_s3 = inlined_call_operand.vmem [shape: f32[1,8,128], index: 3, kind: input, shape index: {}]   ;;  %s1198_s4 = inlined_call_operand.vmem [shape: bf16[128,4], index: 4, kind: input, shape index: {}]   ;;  %s1199_s5 = inlined_call_operand.vmem [shape: f32[1,4], index: 5, kind: input, shape index: {}]   ;;  %s1200_s6 = inlined_call_operand.hbm [shape: f32[2,4,4], index: 6, kind: output, shape index: {}]  }
   0x1   :  { %12 = vsyncpa [#allocation4], 0 }
   0x2   :  { %14 = vsyncpa [#allocation4 + $0x1], 0  ;;  %s1014_s21 = smov 0   ;;  %s1016_s22 = smov 0  }
   0x3   :  { %s1018_s23 = smov 0   ;;  %s1020_s24 = smov 0  }
   0x4 LB: > { %s1035_s25 = sadd.s32 4294967295, %s970_s24   ;;  %s736_s26 = sadd.s32 4294967294, %s970_s24   ;;  %s970_s24 = sphi %s1020_s24, %s1216_s24   ;;  %s966_s23 = sphi %s1018_s23, %s1215_s23   ;;  %s962_s22 = sphi %s1016_s22, %s1214_s22   ;;  %s958_s21 = sphi %s1014_s21, %s1213_s21  }
   0x5   : > { %s1039_s27 = sadd.s32 1, %s970_s24   ;;  %s158_s28 = sadd.s32 1, %s966_s23 }
   0x6   : > { %s155_s29 = ssub.s32 %s970_s24, %s1039_s27  ;;  %p168_p0 = scmp.ne.s32.totalorder %s966_s23, %s962_s22 }
   0x7   : > { %p156_p1 = scmp.eq.s32.totalorder %s155_s29, 0  ;;  %p169_p2 = scmp.eq.s32.totalorder %s1035_s25, 1 }
   0x8   : > { %p174_p3 = scmp.ne.s32.totalorder %s962_s22, %s958_s21  ;;  %p175_p4 = scmp.eq.s32.totalorder %s736_s26, 1 }
   0x9   : > { %s1050_s30 = scalar_select %p156_p1, %s966_s23, %s158_s28  }
   0xa   : > { %p1052_p5 = por %p169_p2, %p168_p0  ;;  %p1056_p6 = por %p175_p4, %p174_p3 }
   0xb   : > { %p737_p7 = scmp.ge.s32.totalorder %s970_s24, 1  ;;  %p182_p8 = scmp.lt.s32.totalorder %s970_s24, 3 }
   0xc   : > { %s1204_s7 = scalar_select %p1052_p5, 1, 0 }
   0xd   : > { %s1205_s8 = scalar_select %p1056_p6, 1, 0 }
   0xe   : > { %p1201_p9 = scmp.eq.s32.totalorder %s1035_s25, 0  ;;  %p1063_p10 = pnand %p737_p7, %p182_p8 }
   0xf   : > { %s972_s10 = smov [#allocation2]   ;;  %s876_s15 = scalar_lea.hbm %s1195_s1, 1024 }
  0x10   : > { %s1206_s9 = scalar_select %p1063_p10, 1, 0 }
  0x11   : > { %s194_s11 = sshll.u32 %s972_s10, 4  ;;  %p807_p11 = pneg %p1063_p10  ;;  %s195_s11 = int_to_ptr.vmem [resolvable:$true] %s194_s11 }
  0x12   : > { %p877_p13 = scmp.ne.s32.totalorder %s1195_s1, %s876_s15  ;;  %p883_p3 = scmp.lt.u32.totalorder %s876_s15, %s1195_s1 }
  0x13   : > { %p1071_p12 = pnand %p1201_p9, %p807_p11 }
  0x15   : > { %p878_p0 = pneg %p1071_p12 }
  0x17   : > { %p879_p1 = pnand %p878_p0, %p877_p13 }
  0x19   : > { %p880_p2 = pneg %p879_p1 }
  0x1b   : > { %p885_p4 = pnand %p883_p3, %p880_p2 }
  0x1d   : > { %888 = shalt.err (!%p885_p4)
}
  0x1e   : > { %s889_s20 = scalar_lea.vmem %s195_s11, 1024  ;;  %p897_p9 = scmp.lt.s32.totalorder %s195_s11, %s195_s11 }
  0x1f   : > { %p890_p7 = scmp.ne.s32.totalorder %s195_s11, %s889_s20  ;;  %p898_p6 = scmp.lt.s32.totalorder %s889_s20, %s889_s20 }
  0x21   : > { %p892_p8 = pnand %p890_p7, %p878_p0  ;;  %p899_p5 = por %p898_p6, %p897_p9 }
  0x23   : > { %p893_p11 = pneg %p892_p8 }
  0x25   : > { %p900_p10 = pnand %p899_p5, %p893_p11 }
  0x27   : > { %903 = shalt.err (!%p900_p10)
}
  0x28   : > { %s973_s26 = smov 256   ;;  %s974_s28 = smov 16  }
  0x29   : > { %810 = dma.hbm_to_vmem [thread:$0]  (!%p1071_p12), %s1195_s1, 1024, %s195_s11, [#allocation3], %s973_s26, %s973_s26, %s974_s28  }
  0x2a   : > { %p1208_p13 = scmp.ne.s32.totalorder %s1206_s9, 0 }
  0x2b   : > { %p1209_p1 = scmp.eq.s32.totalorder (!%p1208_p13), %s1035_s25, 0 }
  0x2c   : > { %230 = sbr.rel (%p1208_p13) target bundleno = 560 (0x230), region = 44 }
  0x33   : > { %949 = dma.done.wait (%p1209_p1), [#allocation3], 1024   ;;  %p1210_p0 = pmov %p1209_p1 }
  0x34   : > { %p260_p5 = scmp.lt.s32.totalorder %s1035_s25, 1  ;;  %v975_v0 = vmov 0   ;;  %v856_v1 = vld [vmem:[#allocation2 + $0x4] ss:$16 sps:$4 sm:$0xff]   ;;  %v858_v2 = vld [vmem:[#allocation2] ss:$16 sps:$4 sm:$0xff]   ;;  %v437_v24 = vlaneseq }
  0x35   : > { %951 = vsyncadd (%p1210_p0), [#allocation3], 4294966272  ;;  %359 = vmatprep.mubr.bf16.mxu1 %v975_v0  ;;  %327 = vmatprep.subr.bf16.mxu1 %v856_v1  ;;  %v859_v3 = vld [vmem:[#allocation2 + $0x24] ss:$16 sps:$4 sm:$0xff]   ;;  %v861_v4 = vld [vmem:[#allocation2 + $0x20] ss:$16 sps:$4 sm:$0xff]  }
  0x36   : > { %s261_s13 = scalar_select %p260_p5, %s1035_s25, 1  ;;  %328 = vmatpush1.bf16.msra.mxu1 %v858_v2  ;;  %v864_v7 = vld [vmem:[#allocation2 + $0xc] ss:$16 sps:$4 sm:$0xff]   ;;  %vm320_vm0 = vcmask 261120   ;;  %v862_v9 = vld [vmem:[#allocation2 + $0x8] ss:$16 sps:$4 sm:$0xff]  }
  0x37   : > { %329 = vmatprep.subr.bf16.mxu1 %v859_v3  ;;  %v867_v10 = vld [vmem:[#allocation2 + $0x2c] ss:$16 sps:$4 sm:$0xff]   ;;  %v865_v13 = vld [vmem:[#allocation2 + $0x28] ss:$16 sps:$4 sm:$0xff]   ;;  %v868_v15 = vld [vmem:[%s1198_s4] sm:$0xff]   ;;  %v976_v16 = vmov 0.0  }
  0x38   : > { %s771_s12 = sshll.u32 %s261_s13, 5  ;;  %781 = vmatprep.subr.bf16.mxu0 %v976_v16  ;;  %v869_v17 = vld [vmem:[%s1198_s4 + $0x8] sm:$0xff]   ;;  %v870_v18 = vld [vmem:[%s1198_s4 + $0x10] sm:$0xff]   ;;  %v871_v19 = vld [vmem:[%s1198_s4 + $0x18] sm:$0xff]   ;;  %vm977_vm1 = vmmov 0   ;;  %v438_v25 = vshrl.u32 %v437_v24, 7 }
  0x39   : > { %s264_s11 = scalar_lea.vmem %s1194_s0, %s771_s12  ;;  %782 = vmatpush3.bf16.msra.mxu0 %v868_v15  ;;  %v872_v20 = vld [vmem:[%s1198_s4 + $0x20] sm:$0xff]   ;;  %v873_v21 = vld [vmem:[%s1198_s4 + $0x28] sm:$0xff]   ;;  %797 = vmatprep.mubr.msk.bf16.mxu0 %vm977_vm1, %v976_v16  ;;  %v874_v22 = vld [vmem:[%s1198_s4 + $0x30] sm:$0xff]   ;;  %vm553_vm5 = vcmask 1041409   ;;  %vm555_vm6 = vcmask 1042434   ;;  %vm557_vm7 = vcmask 1043459  }
  0x3a   : > { %v266_v5 = vld [vmem:[%s264_s11] sm:$0xff]  ;;  %v267_v6 = vld [vmem:[%s264_s11 + $0x8] sm:$0xff]  ;;  %330 = vmatpush1.bf16.msra.mxu1 %v861_v4  ;;  %v268_v11 = vld [vmem:[%s264_s11 + $0x10] sm:$0xff]  ;;  %783 = vmatprep.subr.bf16.mxu0 %v976_v16  ;;  %vm439_vm2 = vcmp.lt.s32.totalorder %v438_v25, 7  ;;  %vm452_vm3 = vcmp.lt.s32.totalorder %v438_v25, 6  ;;  %vm465_vm4 = vcmp.lt.s32.totalorder %v438_v25, 5 }
  0x3b   : > { %v270_v8 = vpack.c.bf16 %v267_v6, %v266_v5  ;;  %380 = vmatprep.subr.bf16.mxu1 %v864_v7  ;;  %v269_v12 = vld [vmem:[%s264_s11 + $0x18] sm:$0xff]  ;;  %v757_v57 = vld [vmem:[%s1196_s2] ss:$0 sm:$0xff]  ;;  %s257_s20 = sand.u32 1, %s962_s22   ;;  %s768_s10 = sshll.u32 %s1035_s25, 6  ;;  %vm649_vm8 = vcmask 27648  }
  0x3c   : > { %v271_v14 = vpack.c.bf16 %v269_v12, %v268_v11  ;;  %v875_v23 = vld [vmem:[%s1198_s4 + $0x38] sm:$0xff]   ;;  %v489_v1 = vld [vmem:[%s1197_s3] sm:$0xff]  ;;  %s742_s26 = sshll.u32 %s257_s20, 2  ;;  %s1152_s11 = scalar_lea.hbm %s1200_s6, %s768_s10 }
  0x3d   : > { %753 = vmatmul.mubr.msk.bf16.vlgmr.msra.gmra.mrb[0].mxu1 %vm320_vm0, %v270_v8  ;;  %784 = vmatpush3.bf16.msra.mxu0 %v869_v17  ;;  %s259_s13 = scalar_lea.vmem [#allocation5], %s742_s26  ;;  %s652_s25 = scalar_lea.sflag [#allocation4], %s257_s20 }
  0x3e   : > { %381 = vmatpush1.bf16.msra.mxu1 %v862_v9  ;;  %369 = vmatprep.mubr.bf16.mxu1 %v975_v0  ;;  %s665_s12 = sshll.u32 %s259_s13, 4  ;;  %p1211_p9 = scmp.ne.s32.totalorder %s1204_s7, 0  ;;  %s1154_s12 = int_to_ptr.vmem [resolvable:$true] %s665_s12 }
  0x3f   : > { %382 = vmatprep.subr.bf16.mxu1 %v867_v10  ;;  %785 = vmatprep.subr.bf16.mxu0 %v976_v16  ;;  %s904_s9 = scalar_lea.vmem %s1154_s12, 64  ;;  %s978_s16 = smov [#allocation5]  }
  0x40   : > { %p905_p6 = scmp.ne.s32.totalorder %s1154_s12, %s904_s9  ;;  %s908_s17 = sshll.u32 %s978_s16, 4  ;;  %s909_s17 = int_to_ptr.vmem [resolvable:$false] %s908_s17 }
  0x41   : > { %786 = vmatpush3.bf16.msra.mxu0 %v870_v18  ;;  %s910_s18 = scalar_lea.vmem %s909_s17, 128  ;;  %p911_p2 = scmp.lt.s32.totalorder %s1154_s12, %s909_s17 }
  0x42   : > { %383 = vmatpush1.bf16.msra.mxu1 %v865_v13  ;;  %787 = vmatprep.subr.bf16.mxu0 %v976_v16  ;;  %p906_p10 = pnand %p905_p6, %p1211_p9  ;;  %p912_p3 = scmp.lt.s32.totalorder %s910_s18, %s904_s9 }
  0x44   : > { %p907_p12 = pneg %p906_p10  ;;  %p913_p4 = por %p912_p3, %p911_p2 }
  0x45   : > { %754 = vmatmul.mubr.msk.bf16.gmra.mrb[4].mxu1 %vm320_vm0, %v271_v14  ;;  %788 = vmatpush3.bf16.msra.mxu0 %v871_v19 }
  0x46   : > { %412 = vmatprep.mubr.bf16.mxu1 %v975_v0  ;;  %789 = vmatprep.subr.bf16.mxu0 %v976_v16  ;;  %p914_p7 = pnand %p913_p4, %p907_p12 }
  0x49   : > { %790 = vmatpush3.bf16.msra.mxu0 %v872_v20 }
  0x4a   : > { %791 = vmatprep.subr.bf16.mxu0 %v976_v16 }
  0x4d   : > { %755 = vmatmul.mubr.msk.bf16.vlgmr.msra.gmra.mrb[8].mxu1 %vm320_vm0, %v270_v8  ;;  %792 = vmatpush3.bf16.msra.mxu0 %v873_v21 }
  0x4e   : > { %422 = vmatprep.mubr.bf16.mxu1 %v975_v0  ;;  %793 = vmatprep.subr.bf16.mxu0 %v976_v16 }
  0x51   : > { %794 = vmatpush3.bf16.msra.mxu0 %v874_v22 }
  0x52   : > { %795 = vmatprep.subr.bf16.mxu0 %v976_v16 }
  0x55   : > { %756 = vmatmul.mubr.msk.bf16.gmra.mrb[12].mxu1 %vm320_vm0, %v271_v14  ;;  %796 = vmatpush3.bf16.msra.mxu0 %v875_v23 }
 0x110   : > { %v361_v26 = vpop.f32.mrb[0].mxu1 }
 0x111   : > { %v363_v27 = vpop.f32.mrb[1].mxu1 }
 0x112   : > { %v365_v28 = vpop.f32.mrb[2].mxu1  ;;  %v433_v30 = vrot.slane %v363_v27, 1 }
 0x113   : > { %v367_v29 = vpop.f32.mrb[3].mxu1 }
 0x114   : > { %v434_v31 = vrot.slane %v367_v29, 1 }
 0x116   : > { %v442_v32 = vsel %vm439_vm2, %v433_v30, %v434_v31 }
 0x117   : > { %v444_v33 = vadd.f32 %v442_v32, %v361_v26 }
 0x118   : > { %v371_v34 = vpop.f32.mrb[4].mxu1 }
 0x119   : > { %v373_v35 = vpop.f32.mrb[5].mxu1 }
 0x11a   : > { %v435_v36 = vrot.slane %v373_v35, 1  ;;  %v375_v37 = vpop.f32.mrb[6].mxu1 }
 0x11b   : > { %v377_v38 = vpop.f32.mrb[7].mxu1 }
 0x11c   : > { %v441_v39 = vsel %vm439_vm2, %v434_v31, %v435_v36  ;;  %v436_v40 = vrot.slane %v377_v38, 1 }
 0x11d   : > { %v445_v41 = vadd.f32 %v441_v39, %v365_v28 }
 0x11e   : > { %v440_v42 = vsel %vm439_vm2, %v435_v36, %v436_v40  ;;  %v443_v43 = vsel %vm439_vm2, %v436_v40, %v433_v30 }
 0x11f   : > { %v446_v44 = vadd.f32 %v440_v42, %v371_v34  ;;  %v447_v45 = vadd.f32 %v443_v43, %v375_v37 }
 0x120   : > { %v414_v46 = vpop.f32.mrb[8].mxu1 }
 0x121   : > { %v416_v47 = vpop.f32.mrb[9].mxu1  ;;  %v448_v49 = vrot.slane %v414_v46, 2 }
 0x122   : > { %v418_v48 = vpop.f32.mrb[10].mxu1  ;;  %v461_v52 = vrot.slane %v416_v47, 3 }
 0x123   : > { %v449_v50 = vrot.slane %v418_v48, 2  ;;  %v420_v51 = vpop.f32.mrb[11].mxu1 }
 0x124   : > { %v462_v53 = vrot.slane %v420_v51, 3 }
 0x125   : > { %v455_v54 = vsel %vm452_vm3, %v448_v49, %v449_v50 }
 0x126   : > { %v457_v55 = vadd.f32 %v455_v54, %v444_v33  ;;  %v468_v56 = vsel %vm465_vm4, %v461_v52, %v462_v53 }
 0x128   : > { %v470_v58 = vadd.f32 %v468_v56, %v457_v55  ;;  %v424_v59 = vpop.f32.mrb[12].mxu1 }
 0x129   : > { %v450_v60 = vrot.slane %v424_v59, 2  ;;  %v426_v61 = vpop.f32.mrb[13].mxu1 }
 0x12a   : > { %v481_v62 = vadd.f32 %v757_v57, %v470_v58  ;;  %v463_v63 = vrot.slane %v426_v61, 3  ;;  %v428_v0 = vpop.f32.mrb[14].mxu1 }
 0x12b   : > { %v454_v2 = vsel %vm452_vm3, %v449_v50, %v450_v60  ;;  %v451_v3 = vrot.slane %v428_v0, 2  ;;  %v430_v4 = vpop.f32.mrb[15].mxu1  ;;  %v758_v0 = vld [vmem:[%s1199_s5] ss:$0 sm:$0xff] }
 0x12c   : > { %v485_v5 = vmax.f32 %v481_v62, 0.0  ;;  %v458_v6 = vadd.f32 %v454_v2, %v445_v41  ;;  %v467_v7 = vsel %vm465_vm4, %v462_v53, %v463_v63  ;;  %v464_v8 = vrot.slane %v430_v4, 3 }
 0x12d   : > { %v453_v9 = vsel %vm452_vm3, %v450_v60, %v451_v3  ;;  %v456_v10 = vsel %vm452_vm3, %v451_v3, %v448_v49 }
 0x12e   : > { %v490_v11 = vmul.f32 %v489_v1, %v485_v5  ;;  %v471_v12 = vadd.f32 %v467_v7, %v458_v6  ;;  %v459_v13 = vadd.f32 %v453_v9, %v446_v44  ;;  %v460_v14 = vadd.f32 %v456_v10, %v447_v45 }
 0x12f   : > { %v466_v15 = vsel %vm465_vm4, %v463_v63, %v464_v8  ;;  %v469_v16 = vsel %vm465_vm4, %v464_v8, %v461_v52 }
 0x130   : > { %v494_v17 = vrot.slane %v490_v11, 4  ;;  %v482_v18 = vadd.f32 %v757_v57, %v471_v12  ;;  %v472_v19 = vadd.f32 %v466_v15, %v459_v13  ;;  %v473_v20 = vadd.f32 %v469_v16, %v460_v14 }
 0x132   : > { %v495_v21 = vmax.f32 %v490_v11, %v494_v17  ;;  %v486_v22 = vmax.f32 %v482_v18, 0.0  ;;  %v483_v23 = vadd.f32 %v757_v57, %v472_v19  ;;  %v484_v24 = vadd.f32 %v757_v57, %v473_v20 }
 0x134   : > { %v496_v26 = vrot.slane %v495_v21, 2  ;;  %v491_v27 = vmul.f32 %v489_v1, %v486_v22  ;;  %v487_v28 = vmax.f32 %v483_v23, 0.0  ;;  %v488_v29 = vmax.f32 %v484_v24, 0.0 }
 0x136   : > { %v497_v30 = vmax.f32 %v495_v21, %v496_v26  ;;  %v500_v31 = vrot.slane %v491_v27, 4  ;;  %v492_v32 = vmul.f32 %v489_v1, %v487_v28  ;;  %v493_v33 = vmul.f32 %v489_v1, %v488_v29 }
 0x138   : > { %v501_v34 = vmax.f32 %v491_v27, %v500_v31  ;;  %v506_v35 = vrot.slane %v492_v32, 4  ;;  %v512_v25 = vrot.slane %v493_v33, 4  ;;  %v498_v36 = vrot.slane %v497_v30, 1 }
 0x13a   : > { %v502_v37 = vrot.slane %v501_v34, 2  ;;  %v507_v38 = vmax.f32 %v492_v32, %v506_v35  ;;  %v513_v39 = vmax.f32 %v493_v33, %v512_v25  ;;  %v499_v42 = vmax.f32 %v497_v30, %v498_v36 }
 0x13c   : > { %v503_v40 = vmax.f32 %v501_v34, %v502_v37  ;;  %v508_v41 = vrot.slane %v507_v38, 2  ;;  %v514_v43 = vrot.slane %v513_v39, 2  ;;  %v518_v50 = vpack.c.bf16 %v499_v42, %v499_v42 }
 0x13e   : > { %v509_v44 = vmax.f32 %v507_v38, %v508_v41  ;;  %v504_v45 = vrot.slane %v503_v40, 1  ;;  %v515_v46 = vmax.f32 %v513_v39, %v514_v43  ;;  %v549_v56 = vunpack.c.l.b16 %v518_v50 }
 0x140   : > { %v505_v47 = vmax.f32 %v503_v40, %v504_v45  ;;  %v510_v48 = vrot.slane %v509_v44, 1  ;;  %v516_v49 = vrot.slane %v515_v46, 1 }
 0x142   : > { %v511_v51 = vmax.f32 %v509_v44, %v510_v48  ;;  %v517_v52 = vmax.f32 %v515_v46, %v516_v49  ;;  %v519_v53 = vpack.c.bf16 %v505_v47, %v505_v47 }
 0x144   : > { %v520_v54 = vpack.c.bf16 %v511_v51, %v511_v51  ;;  %v521_v55 = vpack.c.bf16 %v517_v52, %v517_v52  ;;  %v550_v57 = vunpack.c.l.b16 %v519_v53 }
 0x146   : > { %v551_v58 = vunpack.c.l.b16 %v520_v54  ;;  %v552_v59 = vunpack.c.l.b16 %v521_v55  ;;  %v554_v60 = vsel %vm553_vm5, %v550_v57, %v549_v56 }
 0x148   : > { %v556_v61 = vsel %vm555_vm6, %v551_v58, %v554_v60 }
 0x149   : > { %v558_v62 = vsel %vm557_vm7, %v552_v59, %v556_v61 }
 0x14a   : > { %v559_v63 = vpack.c.b16 %v558_v62, %v558_v62 }
 0x14c   : > { %798 = vmatmul.mubr.bf16.vlgmr.msra.gmra.mrb[0].mxu0 %v559_v63 }
 0x21f   : > { %v643_v1 = vpop.f32.mrb[0].mxu0 }
 0x220   : > { %v644_v2 = vadd.f32 %v758_v0, %v643_v1  ;;  %v799_v3 = vpop.f32.mrb[1].mxu0 }
 0x221   : > { %v646_v4 = vpop.f32.mrb[2].mxu0 }
 0x222   : > { %v800_v5 = vpop.f32.mrb[3].mxu0  ;;  %650 = vst.msk [vmem:[%s259_s13] sm:$0xf] %vm649_vm8, %v644_v2 }
 0x223   : > { %917 = shalt.err (!%p914_p7)
}
 0x224   : > { %s918_s19 = scalar_lea.hbm %s1152_s11, 64  ;;  %s922_s28 = scalar_lea.hbm %s1200_s6, 128 }
 0x225   : > { %p919_p8 = scmp.ne.s32.totalorder %s1152_s11, %s918_s19  ;;  %p923_p1 = scmp.lt.u32.totalorder %s1152_s11, %s1200_s6 }
 0x226   : > { %p924_p0 = scmp.lt.u32.totalorder %s922_s28, %s918_s19  ;;  %p926_p6 = scmp.lt.u32.totalorder %s918_s19, %s1152_s11 }
 0x227   : > { %p920_p11 = pnand %p919_p8, %p1211_p9 }
 0x228   : > { %p925_p5 = por %p924_p0, %p923_p1 }
 0x229   : > { %p921_p13 = pneg %p920_p11 }
 0x22a   : > { %p927_p10 = por %p926_p6, %p925_p5 }
 0x22c   : > { %p928_p12 = pnand %p927_p10, %p921_p13 }
 0x22e   : > { %931 = shalt.err (!%p928_p12)
}
 0x22f   : > { %805 = dma.vmem_to_hbm [thread:$0]  (%p1211_p9), %s1154_s12, 64, %s1152_s11, %s652_s25  }
 0x230 PF: > { %p817_p2 = scmp.ge.s32.totalorder %s970_s24, 2  ;;  %s677_s13 = sand.u32 1, %s958_s21  }
 0x231   : > { %p1212_p3 = scmp.ne.s32.totalorder %s1205_s8, 0  ;;  %s678_s14 = scalar_lea.sflag [#allocation4], %s677_s13 }
 0x233   : > { %p812_p4 = pnand %p817_p2, %p1212_p3 }
 0x235   : > { %953 = dma.done.wait (!%p812_p4), %s678_s14, 64  }
 0x236   : > { %955 = vsyncadd (!%p812_p4), %s678_s14, 4294967232  ;;  %p17_p7 = scmp.ge.s32.totalorder %s1039_s27, 4   ;;  %s1213_s21 = smov %s962_s22 }
 0x237   : > { %s1214_s22 = smov %s966_s23  ;;  %s1215_s23 = smov %s1050_s30 }
 0x238   : > { %s1216_s24 = smov %s1039_s27  ;;  %19 = sbr.rel (!%p17_p7) target bundleno = 4 (0x4), region = 84 }
 0x23f   :  { %683 = vsyncpa [#allocation3], 1 }
 0x240   :  { %685 = vsyncpa [#allocation3 + $0x1], 1 }
 0x241   :  { %686 = vsyncpa [#allocation4], 1 }
 0x242   :  { %688 = vsyncpa [#allocation4 + $0x1], 1 }

</bundles_post_ra>
